<compile_context>
chip_gen: v7x
topology: tpu7x:2x2x1
jax: 0.10.0
libtpu: 0.0.40
codegen_flags: <defaults>
</compile_context>

<pallas_src>
import functools

import jax
import jax.numpy as jnp
from jax.experimental import pallas as pl
from jax.experimental.pallas import tpu as pltpu


# ----------------------------- small helpers --------------------------------

def _round_up(n, m):
    return ((n + m - 1) // m) * m


def _cdiv(a, b):
    return -(-a // b)


def _vmem_capacity_bytes():
    """Physical per-core VMEM; conservative 64 MiB fallback if unqueryable."""
    try:
        return int(pltpu.get_tpu_info().vmem_capacity_bytes)
    except Exception:
        return 64 << 20


def _has_two_tensorcores():
    """True on v7x-style chips that expose 2 TensorCores per device."""
    try:
        kind = jax.devices()[0].device_kind.lower()
        return ("v7" in kind) or ("7x" in kind)
    except Exception:
        return False


# ----------------------- one-time parameter preparation ----------------------

def prepare_params(params, *, num_layers):
    """Pad weights/biases to lane-dense (multiples of 128) shapes and cast
    weights to bf16 ONCE, at init time.  `params` is the flat list
    [w1, b1, ..., w_final, b_final] with weights already transposed to
    (in_features, out_features) and biases shaped (1, out_features)."""
    hidden_size = params[-2].shape[0]
    input_size = params[-2].shape[1]
    inp_pad = _round_up(input_size, 128)
    hid_pad = _round_up(hidden_size, 128)

    padded = []
    in_pad = inp_pad
    idx = 0
    for _ in range(num_layers):
        w, b = params[idx], params[idx + 1]
        idx += 2
        w_p = jnp.zeros((in_pad, hid_pad), jnp.bfloat16)
        w_p = w_p.at[: w.shape[0], : w.shape[1]].set(w.astype(jnp.bfloat16))
        b_p = jnp.zeros((1, hid_pad), jnp.float32)
        b_p = b_p.at[:, : b.shape[1]].set(b.astype(jnp.float32))
        padded += [w_p, b_p]
        in_pad = hid_pad
    wf, bf_ = params[idx], params[idx + 1]
    wf_p = jnp.zeros((hid_pad, inp_pad), jnp.bfloat16)
    wf_p = wf_p.at[: wf.shape[0], : wf.shape[1]].set(wf.astype(jnp.bfloat16))
    bf_p = jnp.zeros((1, inp_pad), jnp.float32)
    bf_p = bf_p.at[:, : bf_.shape[1]].set(bf_.astype(jnp.float32))
    padded += [wf_p, bf_p]
    return [jax.device_put(p) for p in padded]


# -------------------------- fused resident-weight kernel ---------------------

def _make_fnn_kernel(num_layers, nonlinear, average):
    def kernel(x_ref, *refs):
        out_ref = refs[-1]
        params = refs[:-1]                       # [w1, b1, ..., wf, bf]

        x_bf = x_ref[...]                        # (tb, inp_pad) bf16
        y = x_bf                                 # bf16 carried activations
        idx = 0
        for _ in range(num_layers):
            w = params[idx][...]                 # (in_pad, hid_pad) bf16
            b = params[idx + 1][...]             # (1, hid_pad)      f32
            idx += 2
            h = jnp.dot(y, w, preferred_element_type=jnp.float32) + b
            if nonlinear:
                h = jnp.maximum(h, 0.0)
            # TODO(synk): training-mode dropout not implemented (identity).
            y = h.astype(jnp.bfloat16)

        wf = params[idx][...]                    # (hid_pad, inp_pad) bf16
        bf_ = params[idx + 1][...]               # (1, inp_pad)       f32
        out = jnp.dot(y, wf, preferred_element_type=jnp.float32) + bf_
        if average:
            out = (out + x_bf.astype(jnp.float32)) * 0.5
        out_ref[...] = out.astype(out_ref.dtype)

    return kernel


def _resident_footprint(tb, inp_pad, hid_pad, param_bytes, param_bufs):
    mx = max(inp_pad, hid_pad)
    x_io = 2 * tb * inp_pad * 2                  # bf16 x tile, double buffered
    o_io = 2 * tb * inp_pad * 4                  # f32 out tile, double buffered
    act = tb * mx * (4 + 2) + tb * inp_pad * 4   # f32 result + bf16 carry + x
    slack = 2 << 20                              # Mosaic internal scratch
    return param_bufs * param_bytes + x_io + o_io + act + slack


# ------------------------ feature-tiled fallback path ------------------------

def _make_linear_kernel(apply_relu):
    def kernel(x_ref, w_ref, b_ref, o_ref, acc_ref):
        @pl.when(pl.program_id(2) == 0)
        def _():
            acc_ref[...] = jnp.zeros_like(acc_ref)

        acc_ref[...] += jnp.dot(x_ref[...], w_ref[...],
                                preferred_element_type=jnp.float32)

        @pl.when(pl.program_id(2) == pl.num_programs(2) - 1)
        def _():
            r = acc_ref[...] + b_ref[...]
            if apply_relu:
                r = jnp.maximum(r, 0.0)
            o_ref[...] = r.astype(o_ref.dtype)

    return kernel


def _divisor_tile(dim, cands=(512, 256, 128)):
    for c in cands:
        if dim % c == 0:
            return c
    return dim


def _tiled_linear(x, w, b, *, relu, out_dtype, vmem_limit):
    M, K = x.shape
    _, N = w.shape
    tm = _divisor_tile(M, (512, 256, 128, 64, 32, 16, 8))
    tk = _divisor_tile(K)
    tn = _divisor_tile(N)
    grid = (M // tm, N // tn, K // tk)
    return pl.pallas_call(
        _make_linear_kernel(relu),
        out_shape=jax.ShapeDtypeStruct((M, N), out_dtype),
        grid_spec=pltpu.PrefetchScalarGridSpec(
            num_scalar_prefetch=0,
            grid=grid,
            in_specs=[pl.BlockSpec((tm, tk), lambda i, j, k: (i, k)),
                      pl.BlockSpec((tk, tn), lambda i, j, k: (k, j)),
                      pl.BlockSpec((1, tn), lambda i, j, k: (0, j))],
            out_specs=pl.BlockSpec((tm, tn), lambda i, j, k: (i, j)),
            scratch_shapes=[pltpu.VMEM((tm, tn), jnp.float32)],
        ),
        compiler_params=pltpu.CompilerParams(
            dimension_semantics=("parallel", "parallel", "arbitrary"),
            vmem_limit_bytes=int(vmem_limit),
        ),
    )(x, w, b)


def _fnn_forward_tiled(x, padded_params, *, num_layers, nonlinear, average,
                       vmem_limit):
    B, input_size = x.shape
    inp_pad = padded_params[-2].shape[1]

    tm = 256 if B >= 256 else _round_up(max(B, 1), 8)
    B_pad = _round_up(B, tm)
    x_p = jnp.zeros((B_pad, inp_pad), jnp.bfloat16)
    x_p = x_p.at[:B, :input_size].set(x.astype(jnp.bfloat16))

    y = x_p
    idx = 0
    for _ in range(num_layers):
        w, b = padded_params[idx], padded_params[idx + 1]
        idx += 2
        y = _tiled_linear(y, w, b, relu=nonlinear, out_dtype=jnp.bfloat16,
                          vmem_limit=vmem_limit)
    out = _tiled_linear(y, padded_params[idx], padded_params[idx + 1],
                        relu=False, out_dtype=jnp.float32,
                        vmem_limit=vmem_limit)
    if average:
        out = (out + x_p.astype(jnp.float32)) * 0.5
    return out[:B, :input_size]


# ------------------------------- forward pass --------------------------------

def fnn_encoder_forward(x, padded_params, *, num_layers, nonlinear=True,
                        average=True, batch_tile=None):
    """FNNEncoder forward.  `padded_params` comes from prepare_params()."""
    B, input_size = x.shape
    hid_pad = padded_params[-2].shape[0]
    inp_pad = padded_params[-2].shape[1]
    assert inp_pad == _round_up(input_size, 128), "params/x size mismatch"

    param_bytes = sum(int(p.size) * p.dtype.itemsize for p in padded_params)

    vmem_cap = _vmem_capacity_bytes()
    budget = max(32 << 20, vmem_cap - (8 << 20))   # headroom below physical
    two_cores = _has_two_tensorcores()
    single_buf_ok = hasattr(pl, "Buffered")

    def fits(tb, bufs):
        return _resident_footprint(tb, inp_pad, hid_pad,
                                   param_bytes, bufs) <= budget

    # ---- pick batch tile + parameter buffering (capacity-aware) ------------
    tb = None
    param_bufs = 2
    if batch_tile is not None:
        cand_list = [_round_up(int(batch_tile), 8)]
    else:
        tb_cap = min(1024, _round_up(max(B, 1), 8))
        cand_list = [c for c in (1024, 512, 256, 128, 64, 32, 16, 8)
                     if c <= tb_cap]
        if tb_cap not in cand_list:
            cand_list = [tb_cap] + cand_list
    for cand in cand_list:
        if fits(cand, 2):
            tb, param_bufs = cand, 2
            break
        if single_buf_ok and fits(cand, 1):
            tb, param_bufs = cand, 1
            break

    if tb is None:
        # Resident weights don't fit VMEM -> feature-tiled per-layer path.
        return _fnn_forward_tiled(x, padded_params, num_layers=num_layers,
                                  nonlinear=nonlinear, average=average,
                                  vmem_limit=budget)

    # On 2-TC chips make sure the "parallel" grid has >= 2 and an even number
    # of steps (megacore sharding / load balance).  Single-TC chips run one
    # big step to avoid fixed per-step overhead.
    if batch_tile is None and two_cores and _round_up(B, 8) >= 16 \
            and _cdiv(B, tb) < 2:
        tb = _round_up(_cdiv(_round_up(B, 8), 2), 8)
    steps = _cdiv(B, tb)
    if two_cores and steps > 1 and steps % 2 == 1:
        steps += 1
    B_pad = steps * tb
    grid = (steps,)

    # ---- pad x to lane-dense bf16 (only per-call data-dependent work) ------
    if B_pad == B and inp_pad == input_size:
        x_p = x.astype(jnp.bfloat16)
    else:
        x_p = jnp.zeros((B_pad, inp_pad), jnp.bfloat16)
        x_p = x_p.at[:B, :input_size].set(x.astype(jnp.bfloat16))

    # ---- specs / cost / limits ----------------------------------------------
    def param_spec(p):
        if param_bufs == 1:
            # Params are grid-resident (constant block index); one buffer.
            return pl.BlockSpec(p.shape, lambda i: (0, 0),
                                pipeline_mode=pl.Buffered(1))
        return pl.BlockSpec(p.shape, lambda i: (0, 0))

    in_specs = [pl.BlockSpec((tb, inp_pad), lambda i: (i, 0))]
    in_specs += [param_spec(p) for p in padded_params]
    out_spec = pl.BlockSpec((tb, inp_pad), lambda i: (i, 0))

    mm = hid_pad * inp_pad                       # final layer
    if num_layers >= 1:
        mm += inp_pad * hid_pad + (num_layers - 1) * hid_pad * hid_pad
    cost = pl.CostEstimate(
        flops=int(2 * B_pad * mm),
        transcendentals=0,
        bytes_accessed=int(B_pad * inp_pad * 2 + param_bytes
                           + B_pad * inp_pad * 4),
    )

    out_p = pl.pallas_call(
        _make_fnn_kernel(num_layers, nonlinear, average),
        out_shape=jax.ShapeDtypeStruct((B_pad, inp_pad), jnp.float32),
        grid_spec=pltpu.PrefetchScalarGridSpec(
            num_scalar_prefetch=0,
            grid=grid,
            in_specs=in_specs,
            out_specs=out_spec,
        ),
        compiler_params=pltpu.CompilerParams(
            dimension_semantics=("parallel",),
            vmem_limit_bytes=int(budget),
        ),
        cost_estimate=cost,
    )(x_p, *padded_params)

    return out_p[:B, :input_size]


# ------------------------------ init / reference -----------------------------

def init_params(key, input_size, hidden_size, num_layers):
    """Deterministic params (weights pre-transposed to (in, out))."""
    params = []
    in_dim = input_size
    for _ in range(num_layers):
        key, k_w, k_b = jax.random.split(key, 3)
        w = jax.random.normal(k_w, (in_dim, hidden_size), jnp.float32)
        w = w / jnp.sqrt(in_dim)
        b = jax.random.normal(k_b, (1, hidden_size), jnp.float32) * 0.01
        params += [w, b]
        in_dim = hidden_size
    key, k_w, k_b = jax.random.split(key, 3)
    wf = jax.random.normal(k_w, (hidden_size, input_size), jnp.float32)
    wf = wf / jnp.sqrt(hidden_size)
    bf_ = jax.random.normal(k_b, (1, input_size), jnp.float32) * 0.01
    params += [wf, bf_]
    return params


def reference_forward(x, params, *, num_layers, nonlinear=True, average=True):
    """Pure-JAX reference matching the kernel's bf16-in / f32-accumulate
    numerics (bf16 x, bf16 carried activations, f32 bias/ReLU/residual)."""
    xb = x.astype(jnp.bfloat16)
    y = xb
    idx = 0
    for _ in range(num_layers):
        w, b = params[idx], params[idx + 1]
        idx += 2
        h = jnp.dot(y, w.astype(jnp.bfloat16),
                    preferred_element_type=jnp.float32) + b.astype(jnp.float32)
        if nonlinear:
            h = jnp.maximum(h, 0.0)
        y = h.astype(jnp.bfloat16)
    out = jnp.dot(y, params[idx].astype(jnp.bfloat16),
                  preferred_element_type=jnp.float32) + params[idx + 1]
    if average:
        out = (out + xb.astype(jnp.float32)) * 0.5
    return out


# ----------------------------------- main ------------------------------------

if __name__ == "__main__":
    input_size = 16
    hidden_size = 32
    num_layers = 2
    batch = 64

    key = jax.random.PRNGKey(0)
    key, kx = jax.random.split(key)
    x = jax.random.normal(kx, (batch, input_size), jnp.float32)
    params = init_params(key, input_size, hidden_size, num_layers)

    # One-time parameter padding + bf16 cast (hoisted out of the call path).
    padded_params = prepare_params(params, num_layers=num_layers)

    fwd = jax.jit(functools.partial(fnn_encoder_forward,
                                    num_layers=num_layers,
                                    nonlinear=True, average=True))
    out = jax.block_until_ready(fwd(x, padded_params))

    ref = reference_forward(x, params, num_layers=num_layers,
                            nonlinear=True, average=True)
    assert out.shape == (batch, input_size)
    assert jnp.allclose(out, ref, atol=2e-3, rtol=2e-3), "mismatch vs reference"

    print("KERNEL_OK")
</pallas_src>

<mosaic_0001>
module attributes {stable_mosaic.version = 11 : i64} {
  func.func @kernel(%arg0: i32, %arg1: memref<64x128xbf16, #tpu.memory_space<vmem>>, %arg2: memref<128x128xbf16, #tpu.memory_space<vmem>>, %arg3: memref<1x128xf32, #tpu.memory_space<vmem>>, %arg4: memref<128x128xbf16, #tpu.memory_space<vmem>>, %arg5: memref<1x128xf32, #tpu.memory_space<vmem>>, %arg6: memref<128x128xbf16, #tpu.memory_space<vmem>>, %arg7: memref<1x128xf32, #tpu.memory_space<vmem>>, %arg8: memref<64x128xf32, #tpu.memory_space<vmem>>) attributes {dimension_semantics = [#tpu.dimension_semantics<parallel>], iteration_bounds = array<i64: 1>, scalar_prefetch = 0 : i64, scratch_operands = 0 : i64, tpu.core_type = #tpu.core_type<tc>, window_params = [{transform_indices = @transform_0, window_bounds = array<i64: 64, 128>}, {pipeline_mode = #tpu.pipeline_mode<synchronous>, transform_indices = @transform_1, window_bounds = array<i64: 128, 128>}, {pipeline_mode = #tpu.pipeline_mode<synchronous>, transform_indices = @transform_2, window_bounds = array<i64: 1, 128>}, {pipeline_mode = #tpu.pipeline_mode<synchronous>, transform_indices = @transform_3, window_bounds = array<i64: 128, 128>}, {pipeline_mode = #tpu.pipeline_mode<synchronous>, transform_indices = @transform_4, window_bounds = array<i64: 1, 128>}, {pipeline_mode = #tpu.pipeline_mode<synchronous>, transform_indices = @transform_5, window_bounds = array<i64: 128, 128>}, {pipeline_mode = #tpu.pipeline_mode<synchronous>, transform_indices = @transform_6, window_bounds = array<i64: 1, 128>}, {transform_indices = @transform_7, window_bounds = array<i64: 64, 128>}]} {
    %c0 = arith.constant 0 : index
    %c0_0 = arith.constant 0 : index
    %0 = vector.load %arg1[%c0, %c0_0] : memref<64x128xbf16, #tpu.memory_space<vmem>>, vector<64x128xbf16>
    %c0_1 = arith.constant 0 : index
    %c0_2 = arith.constant 0 : index
    %1 = vector.load %arg2[%c0_1, %c0_2] : memref<128x128xbf16, #tpu.memory_space<vmem>>, vector<128x128xbf16>
    %c0_3 = arith.constant 0 : index
    %c0_4 = arith.constant 0 : index
    %2 = vector.load %arg3[%c0_3, %c0_4] : memref<1x128xf32, #tpu.memory_space<vmem>>, vector<1x128xf32>
    %cst = arith.constant dense<0.000000e+00> : vector<64x128xf32>
    %3 = tpu.matmul %0, %1, %cst {dimension_numbers = #tpu.dot_dimension_numbers<[1], [0], [0], [1], [0, 0, 1, 1], [], []>} : vector<64x128xbf16>, vector<128x128xbf16>, vector<64x128xf32> -> vector<64x128xf32>
    %4 = vector.broadcast %2 : vector<1x128xf32> to vector<64x128xf32>
    %5 = arith.addf %3, %4 : vector<64x128xf32>
    %cst_5 = arith.constant 0.000000e+00 : f32
    %6 = vector.broadcast %cst_5 : f32 to vector<64x128xf32>
    %7 = arith.maximumf %5, %6 : vector<64x128xf32>
    %8 = arith.truncf %7 : vector<64x128xf32> to vector<64x128xbf16>
    %c0_6 = arith.constant 0 : index
    %c0_7 = arith.constant 0 : index
    %9 = vector.load %arg4[%c0_6, %c0_7] : memref<128x128xbf16, #tpu.memory_space<vmem>>, vector<128x128xbf16>
    %c0_8 = arith.constant 0 : index
    %c0_9 = arith.constant 0 : index
    %10 = vector.load %arg5[%c0_8, %c0_9] : memref<1x128xf32, #tpu.memory_space<vmem>>, vector<1x128xf32>
    %cst_10 = arith.constant dense<0.000000e+00> : vector<64x128xf32>
    %11 = tpu.matmul %8, %9, %cst_10 {dimension_numbers = #tpu.dot_dimension_numbers<[1], [0], [0], [1], [0, 0, 1, 1], [], []>} : vector<64x128xbf16>, vector<128x128xbf16>, vector<64x128xf32> -> vector<64x128xf32>
    %12 = vector.broadcast %10 : vector<1x128xf32> to vector<64x128xf32>
    %13 = arith.addf %11, %12 : vector<64x128xf32>
    %cst_11 = arith.constant 0.000000e+00 : f32
    %14 = vector.broadcast %cst_11 : f32 to vector<64x128xf32>
    %15 = arith.maximumf %13, %14 : vector<64x128xf32>
    %16 = arith.truncf %15 : vector<64x128xf32> to vector<64x128xbf16>
    %c0_12 = arith.constant 0 : index
    %c0_13 = arith.constant 0 : index
    %17 = vector.load %arg6[%c0_12, %c0_13] : memref<128x128xbf16, #tpu.memory_space<vmem>>, vector<128x128xbf16>
    %c0_14 = arith.constant 0 : index
    %c0_15 = arith.constant 0 : index
    %18 = vector.load %arg7[%c0_14, %c0_15] : memref<1x128xf32, #tpu.memory_space<vmem>>, vector<1x128xf32>
    %cst_16 = arith.constant dense<0.000000e+00> : vector<64x128xf32>
    %19 = tpu.matmul %16, %17, %cst_16 {dimension_numbers = #tpu.dot_dimension_numbers<[1], [0], [0], [1], [0, 0, 1, 1], [], []>} : vector<64x128xbf16>, vector<128x128xbf16>, vector<64x128xf32> -> vector<64x128xf32>
    %20 = vector.broadcast %18 : vector<1x128xf32> to vector<64x128xf32>
    %21 = arith.addf %19, %20 : vector<64x128xf32>
    %22 = arith.extf %0 : vector<64x128xbf16> to vector<64x128xf32>
    %23 = arith.addf %21, %22 : vector<64x128xf32>
    %cst_17 = arith.constant 5.000000e-01 : f32
    %24 = vector.broadcast %cst_17 : f32 to vector<64x128xf32>
    %25 = arith.mulf %23, %24 : vector<64x128xf32>
    %c0_18 = arith.constant 0 : index
    %c0_19 = arith.constant 0 : index
    %26 = vector.load %arg8[%c0_18, %c0_19] : memref<64x128xf32, #tpu.memory_space<vmem>>, vector<64x128xf32>
    tpu.vector_store %arg8[%c0_18, %c0_19], %25 {strides = array<i32>} : memref<64x128xf32, #tpu.memory_space<vmem>>, vector<64x128xf32>,
    return
  }
  func.func @transform_0(%arg0: i32) -> (i32, i32) {
    %c0_i32 = arith.constant 0 : i32
    %c0_i32_0 = arith.constant 0 : i32
    return %arg0, %c0_i32 : i32, i32
  }
  func.func @transform_1(%arg0: i32) -> (i32, i32) {
    %c0_i32 = arith.constant 0 : i32
    %c0_i32_0 = arith.constant 0 : i32
    %c0_i32_1 = arith.constant 0 : i32
    return %c0_i32, %c0_i32_0 : i32, i32
  }
  func.func @transform_2(%arg0: i32) -> (i32, i32) {
    %c0_i32 = arith.constant 0 : i32
    %c0_i32_0 = arith.constant 0 : i32
    %c0_i32_1 = arith.constant 0 : i32
    return %c0_i32, %c0_i32_0 : i32, i32
  }
  func.func @transform_3(%arg0: i32) -> (i32, i32) {
    %c0_i32 = arith.constant 0 : i32
    %c0_i32_0 = arith.constant 0 : i32
    %c0_i32_1 = arith.constant 0 : i32
    return %c0_i32, %c0_i32_0 : i32, i32
  }
  func.func @transform_4(%arg0: i32) -> (i32, i32) {
    %c0_i32 = arith.constant 0 : i32
    %c0_i32_0 = arith.constant 0 : i32
    %c0_i32_1 = arith.constant 0 : i32
    return %c0_i32, %c0_i32_0 : i32, i32
  }
  func.func @transform_5(%arg0: i32) -> (i32, i32) {
    %c0_i32 = arith.constant 0 : i32
    %c0_i32_0 = arith.constant 0 : i32
    %c0_i32_1 = arith.constant 0 : i32
    return %c0_i32, %c0_i32_0 : i32, i32
  }
  func.func @transform_6(%arg0: i32) -> (i32, i32) {
    %c0_i32 = arith.constant 0 : i32
    %c0_i32_0 = arith.constant 0 : i32
    %c0_i32_1 = arith.constant 0 : i32
    return %c0_i32, %c0_i32_0 : i32, i32
  }
  func.func @transform_7(%arg0: i32) -> (i32, i32) {
    %c0_i32 = arith.constant 0 : i32
    %c0_i32_0 = arith.constant 0 : i32
    return %arg0, %c0_i32 : i32, i32
  }
}

</mosaic_0001>

<bundles_post_ra>
// kernel: fnn_encoder_forward.1
= control target key start
LH: loop header
LB: loop body
LE: loop exit
PB: predicated region body
PF: predicated region fallthrough
CT: control target
= control target key end

     0   :  { %s891_s1 = inlined_call_operand.vmem [shape: bf16[128,128], index: 1, kind: input, shape index: {}]   ;;  %s892_s0 = inlined_call_operand.vmem [shape: bf16[64,128], index: 0, kind: input, shape index: {}]   ;;  %s893_s3 = inlined_call_operand.vmem [shape: bf16[128,128], index: 3, kind: input, shape index: {}]   ;;  %s894_s5 = inlined_call_operand.vmem [shape: bf16[128,128], index: 5, kind: input, shape index: {}]   ;;  %s895_s2 = inlined_call_operand.vmem [shape: f32[1,128], index: 2, kind: input, shape index: {}]   ;;  %s896_s4 = inlined_call_operand.vmem [shape: f32[1,128], index: 4, kind: input, shape index: {}]   ;;  %s897_s6 = inlined_call_operand.vmem [shape: f32[1,128], index: 6, kind: input, shape index: {}]   ;;  %s898_s7 = inlined_call_operand.vmem [shape: f32[64,128], index: 7, kind: output, shape index: {}]  }
   0x1   :  { %v682_v0 = vld [vmem:[%s891_s1] sm:$0xff]   ;;  %v683_v1 = vld [vmem:[%s891_s1 + $0x8] sm:$0xff]   ;;  %v684_v2 = vld [vmem:[%s891_s1 + $0x10] sm:$0xff]  }
   0x2   :  { %594 = vmatprep.subr.bf16.mxu0 %v682_v0  ;;  %v685_v3 = vld [vmem:[%s891_s1 + $0x18] sm:$0xff]   ;;  %v769_v4 = vld [vmem:[%s892_s0] sm:$0xff]   ;;  %v695_v6 = vld [vmem:[%s893_s3 + $0x8] sm:$0xff]  }
   0x3   :  { %595 = vmatpush3.bf16.msra.mxu0 %v682_v0  ;;  %v694_v5 = vld [vmem:[%s893_s3] sm:$0xff]   ;;  %610 = vmatprep.mubr.bf16.mxu0 %v769_v4  ;;  %v696_v8 = vld [vmem:[%s893_s3 + $0x10] sm:$0xff]   ;;  %v687_v9 = vld [vmem:[%s891_s1 + $0x28] sm:$0xff]  }
   0x4   :  { %596 = vmatprep.subr.bf16.mxu0 %v683_v1  ;;  %v686_v7 = vld [vmem:[%s891_s1 + $0x20] sm:$0xff]   ;;  %618 = vmatprep.subr.bf16.mxu1 %v694_v5  ;;  %v697_v10 = vld [vmem:[%s893_s3 + $0x18] sm:$0xff]   ;;  %v688_v11 = vld [vmem:[%s891_s1 + $0x30] sm:$0xff]  }
   0x5   :  { %619 = vmatpush3.bf16.msra.mxu1 %v694_v5  ;;  %v698_v12 = vld [vmem:[%s893_s3 + $0x20] sm:$0xff]   ;;  %v689_v13 = vld [vmem:[%s891_s1 + $0x38] sm:$0xff]   ;;  %v699_v14 = vld [vmem:[%s893_s3 + $0x28] sm:$0xff]  }
   0x6   :  { %620 = vmatprep.subr.bf16.mxu1 %v695_v6  ;;  %v805_v15 = vld [vmem:[%s892_s0 + $0x8] sm:$0xff]   ;;  %v810_v16 = vld [vmem:[%s892_s0 + $0x10] sm:$0xff]   ;;  %v817_v17 = vld [vmem:[%s892_s0 + $0x18] sm:$0xff]  }
   0x7   :  { %597 = vmatpush3.bf16.msra.mxu0 %v683_v1  ;;  %v700_v18 = vld [vmem:[%s893_s3 + $0x30] sm:$0xff]   ;;  %v701_v19 = vld [vmem:[%s893_s3 + $0x38] sm:$0xff]   ;;  %v702_v20 = vld [vmem:[%s894_s5] sm:$0xff]  }
   0x8   :  { %598 = vmatprep.subr.bf16.mxu0 %v684_v2  ;;  %v703_v21 = vld [vmem:[%s894_s5 + $0x8] sm:$0xff]   ;;  %v704_v22 = vld [vmem:[%s894_s5 + $0x10] sm:$0xff]   ;;  %v705_v23 = vld [vmem:[%s894_s5 + $0x18] sm:$0xff]  }
   0x9   :  { %621 = vmatpush3.bf16.msra.mxu1 %v695_v6  ;;  %v706_v24 = vld [vmem:[%s894_s5 + $0x20] sm:$0xff]   ;;  %v707_v25 = vld [vmem:[%s894_s5 + $0x28] sm:$0xff]   ;;  %v708_v55 = vld [vmem:[%s894_s5 + $0x30] sm:$0xff]  }
   0xa   :  { %622 = vmatprep.subr.bf16.mxu1 %v696_v8  ;;  %v527_v26 = vld [vmem:[%s895_s2] ss:$0 sm:$0xff]  ;;  %v709_v56 = vld [vmem:[%s894_s5 + $0x38] sm:$0xff]  }
   0xb   :  { %599 = vmatpush3.bf16.msra.mxu0 %v684_v2  ;;  %v540_v57 = vld [vmem:[%s896_s4] ss:$0 sm:$0xff] }
   0xc   :  { %600 = vmatprep.subr.bf16.mxu0 %v685_v3 }
   0xd   :  { %623 = vmatpush3.bf16.msra.mxu1 %v696_v8 }
   0xe   :  { %624 = vmatprep.subr.bf16.mxu1 %v697_v10 }
   0xf   :  { %601 = vmatpush3.bf16.msra.mxu0 %v685_v3 }
  0x10   :  { %602 = vmatprep.subr.bf16.mxu0 %v686_v7 }
  0x11   :  { %625 = vmatpush3.bf16.msra.mxu1 %v697_v10 }
  0x12   :  { %626 = vmatprep.subr.bf16.mxu1 %v698_v12 }
  0x13   :  { %603 = vmatpush3.bf16.msra.mxu0 %v686_v7 }
  0x14   :  { %604 = vmatprep.subr.bf16.mxu0 %v687_v9 }
  0x15   :  { %627 = vmatpush3.bf16.msra.mxu1 %v698_v12 }
  0x16   :  { %628 = vmatprep.subr.bf16.mxu1 %v699_v14 }
  0x17   :  { %605 = vmatpush3.bf16.msra.mxu0 %v687_v9 }
  0x18   :  { %606 = vmatprep.subr.bf16.mxu0 %v688_v11 }
  0x19   :  { %629 = vmatpush3.bf16.msra.mxu1 %v699_v14 }
  0x1a   :  { %630 = vmatprep.subr.bf16.mxu1 %v700_v18 }
  0x1b   :  { %607 = vmatpush3.bf16.msra.mxu0 %v688_v11 }
  0x1c   :  { %608 = vmatprep.subr.bf16.mxu0 %v689_v13 }
  0x1d   :  { %631 = vmatpush3.bf16.msra.mxu1 %v700_v18 }
  0x1e   :  { %632 = vmatprep.subr.bf16.mxu1 %v701_v19 }
  0x1f   :  { %609 = vmatpush3.bf16.msra.mxu0 %v689_v13 }
  0x20   :  { %642 = vmatprep.subr.bf16.mxu0 %v702_v20 }
  0x21   :  { %633 = vmatpush3.bf16.msra.mxu1 %v701_v19 }
  0x22   :  { %611 = vmatmul.mubr.bf16.vlgmr.msra.gmra.mrb[0].mxu0 %v805_v15  ;;  %666 = vmatprep.subr.bf16.mxu1 %v702_v20 }
  0x23   :  { %614 = vmatprep.mubr.bf16.mxu0 %v810_v16  ;;  %643 = vmatpush3.bf16.msra.mxu0 %v702_v20 }
  0x24   :  { %644 = vmatprep.subr.bf16.mxu0 %v703_v21 }
  0x27   :  { %645 = vmatpush3.bf16.msra.mxu0 %v703_v21 }
  0x28   :  { %646 = vmatprep.subr.bf16.mxu0 %v704_v22 }
  0x2a   :  { %615 = vmatmul.mubr.bf16.gmra.mrb[4].mxu0 %v817_v17 }
  0x2b   :  { %647 = vmatpush3.bf16.msra.mxu0 %v704_v22 }
  0x2c   :  { %648 = vmatprep.subr.bf16.mxu0 %v705_v23 }
  0x2f   :  { %649 = vmatpush3.bf16.msra.mxu0 %v705_v23 }
  0x30   :  { %650 = vmatprep.subr.bf16.mxu0 %v706_v24 }
  0x33   :  { %651 = vmatpush3.bf16.msra.mxu0 %v706_v24 }
  0x34   :  { %652 = vmatprep.subr.bf16.mxu0 %v707_v25 }
  0x37   :  { %653 = vmatpush3.bf16.msra.mxu0 %v707_v25 }
  0x38   :  { %654 = vmatprep.subr.bf16.mxu0 %v708_v55 }
  0x3b   :  { %655 = vmatpush3.bf16.msra.mxu0 %v708_v55 }
  0x3c   :  { %656 = vmatprep.subr.bf16.mxu0 %v709_v56 }
  0x3f   :  { %657 = vmatpush3.bf16.msra.mxu0 %v709_v56 }
  0xf5   :  { %v612_v27 = vpop.f32.mrb[0].mxu0 }
  0xf6   :  { %v173_v28 = vadd.f32 %v612_v27, %v527_v26  ;;  %v164_v29 = vpop.f32.mrb[1].mxu0  ;;  %v493_v27 = vunpack.c.l.bf16 %v805_v15 }
  0xf7   :  { %v165_v30 = vadd.f32 %v527_v26, %v164_v29  ;;  %v613_v31 = vpop.f32.mrb[2].mxu0 }
  0xf8   :  { %v176_v32 = vadd.f32 %v613_v31, %v527_v26  ;;  %v167_v33 = vpop.f32.mrb[3].mxu0  ;;  %v197_v35 = vmax.f32 %v173_v28, 0.0  ;;  %v491_v28 = vunpack.c.l.bf16 %v769_v4 }
  0xf9   :  { %v168_v34 = vadd.f32 %v527_v26, %v167_v33  ;;  %v195_v37 = vmax.f32 %v165_v30, 0.0  ;;  %v492_v33 = vunpack.c.h.bf16 %v769_v4 }
  0xfa   :  { %v198_v36 = vmax.f32 %v176_v32, 0.0  ;;  %v494_v32 = vunpack.c.h.bf16 %v805_v15  ;;  %v497_v15 = vunpack.c.l.bf16 %v817_v17 }
  0xfb   :  { %v196_v38 = vmax.f32 %v168_v34, 0.0 }
  0xfc   :  { %v204_v39 = vpack.c.bf16 %v198_v36, %v197_v35 }
  0xfd   :  { %v616_v40 = vpop.f32.mrb[4].mxu0  ;;  %v203_v41 = vpack.c.bf16 %v196_v38, %v195_v37 }
  0xfe   :  { %v189_v42 = vadd.f32 %v616_v40, %v527_v26  ;;  %v180_v43 = vpop.f32.mrb[5].mxu0 }
  0xff   :  { %v181_v44 = vadd.f32 %v527_v26, %v180_v43  ;;  %v617_v45 = vpop.f32.mrb[6].mxu0  ;;  %634 = vmatprep.mubr.bf16.mxu1 %v203_v41 }
 0x100   :  { %v192_v46 = vadd.f32 %v617_v45, %v527_v26  ;;  %v183_v47 = vpop.f32.mrb[7].mxu0  ;;  %635 = vmatmul.mubr.bf16.vlgmr.msra.gmra.mrb[0].mxu1 %v204_v39  ;;  %v201_v49 = vmax.f32 %v189_v42, 0.0 }
 0x101   :  { %v184_v48 = vadd.f32 %v527_v26, %v183_v47  ;;  %674 = vmatpush3.bf16.msra.mxu1 %v702_v20  ;;  %v199_v51 = vmax.f32 %v181_v44, 0.0  ;;  %v549_v26 = vld [vmem:[%s897_s6] ss:$0 sm:$0xff]  ;;  %v495_v47 = vunpack.c.l.bf16 %v810_v16 }
 0x102   :  { %v202_v50 = vmax.f32 %v192_v46, 0.0  ;;  %667 = vmatprep.subr.bf16.mxu1 %v703_v21 }
 0x103   :  { %v200_v52 = vmax.f32 %v184_v48, 0.0 }
 0x104   :  { %v206_v53 = vpack.c.bf16 %v202_v50, %v201_v49  ;;  %v498_v50 = vunpack.c.h.bf16 %v817_v17 }
 0x105   :  { %v205_v54 = vpack.c.bf16 %v200_v52, %v199_v51  ;;  %675 = vmatpush3.bf16.msra.mxu1 %v703_v21 }
 0x106   :  { %668 = vmatprep.subr.bf16.mxu1 %v704_v22 }
 0x107   :  { %638 = vmatprep.mubr.bf16.mxu1 %v205_v54 }
 0x108   :  { %639 = vmatmul.mubr.bf16.gmra.mrb[4].mxu1 %v206_v53  ;;  %v496_v53 = vunpack.c.h.bf16 %v810_v16 }
 0x109   :  { %676 = vmatpush3.bf16.msra.mxu1 %v704_v22 }
 0x10a   :  { %669 = vmatprep.subr.bf16.mxu1 %v705_v23 }
 0x10d   :  { %677 = vmatpush3.bf16.msra.mxu1 %v705_v23 }
 0x10e   :  { %670 = vmatprep.subr.bf16.mxu1 %v706_v24 }
 0x111   :  { %678 = vmatpush3.bf16.msra.mxu1 %v706_v24 }
 0x112   :  { %671 = vmatprep.subr.bf16.mxu1 %v707_v25 }
 0x115   :  { %679 = vmatpush3.bf16.msra.mxu1 %v707_v25 }
 0x116   :  { %672 = vmatprep.subr.bf16.mxu1 %v708_v55 }
 0x119   :  { %680 = vmatpush3.bf16.msra.mxu1 %v708_v55 }
 0x11a   :  { %673 = vmatprep.subr.bf16.mxu1 %v709_v56 }
 0x11d   :  { %681 = vmatpush3.bf16.msra.mxu1 %v709_v56 }
 0x1d3   :  { %v636_v58 = vpop.f32.mrb[0].mxu1 }
 0x1d4   :  { %v321_v59 = vadd.f32 %v636_v58, %v540_v57  ;;  %v312_v60 = vpop.f32.mrb[1].mxu1 }
 0x1d5   :  { %v313_v61 = vadd.f32 %v540_v57, %v312_v60  ;;  %v637_v62 = vpop.f32.mrb[2].mxu1 }
 0x1d6   :  { %v324_v63 = vadd.f32 %v637_v62, %v540_v57  ;;  %v315_v0 = vpop.f32.mrb[3].mxu1  ;;  %v345_v2 = vmax.f32 %v321_v59, 0.0 }
 0x1d7   :  { %v316_v1 = vadd.f32 %v540_v57, %v315_v0  ;;  %v343_v5 = vmax.f32 %v313_v61, 0.0 }
 0x1d8   :  { %v346_v3 = vmax.f32 %v324_v63, 0.0 }
 0x1d9   :  { %v344_v6 = vmax.f32 %v316_v1, 0.0 }
 0x1da   :  { %v352_v7 = vpack.c.bf16 %v346_v3, %v345_v2 }
 0x1db   :  { %v351_v8 = vpack.c.bf16 %v344_v6, %v343_v5  ;;  %v640_v9 = vpop.f32.mrb[4].mxu1 }
 0x1dc   :  { %v337_v10 = vadd.f32 %v640_v9, %v540_v57  ;;  %v328_v11 = vpop.f32.mrb[5].mxu1 }
 0x1dd   :  { %v329_v12 = vadd.f32 %v540_v57, %v328_v11  ;;  %v641_v13 = vpop.f32.mrb[6].mxu1  ;;  %658 = vmatprep.mubr.bf16.mxu0 %v351_v8 }
 0x1de   :  { %v340_v14 = vadd.f32 %v641_v13, %v540_v57  ;;  %v331_v18 = vpop.f32.mrb[7].mxu1  ;;  %659 = vmatmul.mubr.bf16.vlgmr.msra.gmra.mrb[8].mxu0 %v352_v7  ;;  %v349_v20 = vmax.f32 %v337_v10, 0.0 }
 0x1df   :  { %v332_v19 = vadd.f32 %v540_v57, %v331_v18  ;;  %v347_v22 = vmax.f32 %v329_v12, 0.0 }
 0x1e0   :  { %v350_v21 = vmax.f32 %v340_v14, 0.0 }
 0x1e1   :  { %v348_v23 = vmax.f32 %v332_v19, 0.0 }
 0x1e2   :  { %v354_v24 = vpack.c.bf16 %v350_v21, %v349_v20 }
 0x1e3   :  { %v353_v25 = vpack.c.bf16 %v348_v23, %v347_v22 }
 0x1e5   :  { %662 = vmatprep.mubr.bf16.mxu1 %v353_v25 }
 0x1e6   :  { %663 = vmatmul.mubr.bf16.vlgmr.msra.gmra.mrb[8].mxu1 %v354_v24 }
 0x2b1   :  { %v660_v29 = vpop.f32.mrb[8].mxu0 }
 0x2b2   :  { %v469_v30 = vadd.f32 %v660_v29, %v549_v26  ;;  %v460_v31 = vpop.f32.mrb[9].mxu0 }
 0x2b3   :  { %v461_v34 = vadd.f32 %v549_v26, %v460_v31  ;;  %v661_v35 = vpop.f32.mrb[10].mxu0 }
 0x2b4   :  { %v501_v36 = vadd.f32 %v493_v27, %v469_v30  ;;  %v472_v37 = vadd.f32 %v661_v35, %v549_v26  ;;  %v463_v38 = vpop.f32.mrb[11].mxu0 }
 0x2b5   :  { %v499_v39 = vadd.f32 %v491_v28, %v461_v34  ;;  %v464_v40 = vadd.f32 %v549_v26, %v463_v38 }
 0x2b6   :  { %v509_v41 = vmul.f32 0.5, %v501_v36  ;;  %v502_v42 = vadd.f32 %v494_v32, %v472_v37 }
 0x2b7   :  { %v507_v43 = vmul.f32 0.5, %v499_v39  ;;  %v500_v44 = vadd.f32 %v492_v33, %v464_v40 }
 0x2b8   :  { %517 = vst [vmem:[%s898_s7 + $0x10] sm:$0xff] %v509_v41  ;;  %v510_v45 = vmul.f32 0.5, %v502_v42 }
 0x2b9   :  { %515 = vst [vmem:[%s898_s7] sm:$0xff] %v507_v43  ;;  %v508_v4 = vmul.f32 0.5, %v500_v44  ;;  %v664_v46 = vpop.f32.mrb[8].mxu1 }
 0x2ba   :  { %518 = vst [vmem:[%s898_s7 + $0x18] sm:$0xff] %v510_v45  ;;  %v485_v48 = vadd.f32 %v664_v46, %v549_v26  ;;  %v476_v49 = vpop.f32.mrb[9].mxu1 }
 0x2bb   :  { %516 = vst [vmem:[%s898_s7 + $0x8] sm:$0xff] %v508_v4  ;;  %v477_v51 = vadd.f32 %v549_v26, %v476_v49  ;;  %v665_v52 = vpop.f32.mrb[10].mxu1 }
 0x2bc   :  { %v505_v54 = vadd.f32 %v497_v15, %v485_v48  ;;  %v488_v55 = vadd.f32 %v665_v52, %v549_v26  ;;  %v479_v56 = vpop.f32.mrb[11].mxu1 }
 0x2bd   :  { %v503_v57 = vadd.f32 %v495_v47, %v477_v51  ;;  %v480_v58 = vadd.f32 %v549_v26, %v479_v56 }
 0x2be   :  { %v513_v59 = vmul.f32 0.5, %v505_v54  ;;  %v506_v60 = vadd.f32 %v498_v50, %v488_v55 }
 0x2bf   :  { %v511_v61 = vmul.f32 0.5, %v503_v57  ;;  %v504_v62 = vadd.f32 %v496_v53, %v480_v58 }
 0x2c0   :  { %521 = vst [vmem:[%s898_s7 + $0x30] sm:$0xff] %v513_v59  ;;  %v514_v17 = vmul.f32 0.5, %v506_v60 }
 0x2c1   :  { %519 = vst [vmem:[%s898_s7 + $0x20] sm:$0xff] %v511_v61  ;;  %v512_v63 = vmul.f32 0.5, %v504_v62 }
 0x2c2   :  { %522 = vst [vmem:[%s898_s7 + $0x38] sm:$0xff] %v514_v17 }
 0x2c3   :  { %520 = vst [vmem:[%s898_s7 + $0x28] sm:$0xff] %v512_v63 }

</bundles_post_ra>
